<compile_context>
chip_gen: v7x
topology: tpu7x:2x2x1
jax: 0.10.0
libtpu: 0.0.40
codegen_flags: <defaults>
</compile_context>

<pallas_src>
import functools

import jax
import jax.numpy as jnp
from jax.experimental import pallas as pl
from jax.experimental.pallas import tpu as pltpu


def _round_up(x, m):
    return ((x + m - 1) // m) * m


def ncf_mlp_kernel(x_ref, w1_ref, b1_ref, w2_ref, b2_ref, w3_ref, b3_ref, o_ref):
    """Fused 3-layer MLP on one batch tile.

    x_ref  : (TILE_B, 2D) fused [user|item] embedding tile (lane-dense, K=2D=128).
    w*_ref : BN-folded weights/biases, VMEM-resident across the grid.
    o_ref  : (TILE_B, 1) sigmoid output.
    """
    # Layer 1: single K=2D MXU dot, f32 accumulation.
    h1 = jnp.dot(x_ref[...], w1_ref[...],
                 preferred_element_type=jnp.float32) + b1_ref[...]
    h1 = jnp.maximum(h1, 0.0)

    # Layer 2.
    h2 = jnp.dot(h1.astype(w2_ref.dtype), w2_ref[...],
                 preferred_element_type=jnp.float32) + b2_ref[...]
    h2 = jnp.maximum(h2, 0.0)

    # Output layer: 1-column MXU dot (MXU is idle in this DMA-bound kernel;
    # avoids tb/8 cross-lane XLU reductions). Kept in f32 for accuracy.
    logit = jnp.dot(h2, w3_ref[...],
                    preferred_element_type=jnp.float32) + b3_ref[...]
    o_ref[...] = jax.nn.sigmoid(logit)


def fold_bn_params(params, compute_dtype):
    """Fold eval-mode BatchNorm affine into the linear layers and cast the
    streamed operands (embedding tables + matmul weights) to compute_dtype.
    Done once, wrapper-side."""
    w1 = params["w1"] * params["bn1_scale"]                        # (2D, H1)
    b1 = params["b1"] * params["bn1_scale"] + params["bn1_shift"]  # (1, H1)
    w2 = params["w2"] * params["bn2_scale"]                        # (H1, H2)
    b2 = params["b2"] * params["bn2_scale"] + params["bn2_shift"]  # (1, H2)
    return {
        # Tables in compute dtype -> the XLA gather writes compute_dtype bytes.
        "user_embedding": params["user_embedding"].astype(compute_dtype),
        "item_embedding": params["item_embedding"].astype(compute_dtype),
        "w1": w1.astype(compute_dtype),                            # (2D, H1)
        "b1": b1.astype(jnp.float32),
        "w2": w2.astype(compute_dtype),                            # (H1, H2)
        "b2": b2.astype(jnp.float32),
        "w3": params["w3"].astype(jnp.float32),                    # (H2, 1)
        "b3": params["b3"].astype(jnp.float32),                    # (1, 1)
    }


def _choose_tile(B, tile_b, sublane, per_row_bytes, fixed_bytes, budget_bytes):
    """Pick a batch tile that (a) respects the VMEM budget, (b) is a multiple of
    the dtype sublane count, (c) minimizes padding waste, and (d) gives >=2 grid
    steps for large batches (v7x dual TensorCore)."""
    max_tb = max(sublane,
                 ((budget_bytes - fixed_bytes) // per_row_bytes) // sublane * sublane)
    tile_b = max(sublane, min(tile_b, max_tb))
    n_tiles = pl.cdiv(B, tile_b)
    if n_tiles == 1 and B > 8192:
        n_tiles = 2                      # feed both v7x TensorCores
    tb = _round_up(pl.cdiv(B, n_tiles), sublane)
    return tb, n_tiles * tb


def ncf_forward(params, user_ids, item_ids, *,
                tile_b=None, compute_dtype=jnp.float32):
    """Full ImprovedNCFModel forward. Embedding gather + concat stay in XLA
    (lane-dense (B, 2D) stream); the fused MLP runs as one batch-tiled Pallas
    kernel with VMEM-resident weights."""
    fused = fold_bn_params(params, compute_dtype)
    D = params["user_embedding"].shape[1]
    K = 2 * D
    H1 = fused["w1"].shape[1]
    H2 = fused["w2"].shape[1]

    dtype_bytes = jnp.dtype(compute_dtype).itemsize
    sublane = {1: 32, 2: 16}.get(dtype_bytes, 8)
    if tile_b is None:
        tile_b = 16384 if dtype_bytes <= 2 else 8192

    # Single fused activation stream (B, 2D) in compute dtype.
    x = jnp.concatenate(
        [fused["user_embedding"][user_ids], fused["item_embedding"][item_ids]],
        axis=1)                                                    # (B, 2D)
    B = x.shape[0]

    # VMEM accounting: double-buffered activation + output tiles, f32 h1/h2
    # intermediates, resident weights/biases.
    per_row = 2 * K * dtype_bytes + 2 * 4 + (H1 + H2) * 4
    weight_bytes = (K * H1 + H1 * H2) * dtype_bytes + (H1 + 2 * H2 + 1 + H2) * 4
    fixed = weight_bytes + (2 << 20)                               # + margin
    tb, b_pad = _choose_tile(B, tile_b, sublane, per_row, fixed,
                             budget_bytes=40 << 20)

    if b_pad != B:
        x = jnp.pad(x, ((0, b_pad - B), (0, 0)))
    grid = (b_pad // tb,)

    def resident(shape):
        return pl.BlockSpec(shape, lambda i: (0, 0))

    est_vmem = tb * per_row + weight_bytes
    vmem_limit = int(min(max(est_vmem + (8 << 20), 32 << 20), 48 << 20))

    cost = pl.CostEstimate(
        flops=2 * b_pad * (K * H1 + H1 * H2 + H2),
        transcendentals=b_pad,
        bytes_accessed=(b_pad * K * dtype_bytes                    # activations in
                        + b_pad * 4                                # sigmoid out
                        + (K * H1 + H1 * H2) * dtype_bytes         # weights
                        + (H1 + 2 * H2 + 1 + H2) * 4),             # biases + w3
    )

    out = pl.pallas_call(
        ncf_mlp_kernel,
        out_shape=jax.ShapeDtypeStruct((b_pad, 1), jnp.float32),
        grid=grid,
        in_specs=[
            pl.BlockSpec((tb, K), lambda i: (i, 0)),               # streamed acts
            resident((K, H1)), resident((1, H1)),
            resident((H1, H2)), resident((1, H2)),
            resident((H2, 1)), resident((1, 1)),
        ],
        out_specs=pl.BlockSpec((tb, 1), lambda i: (i, 0)),
        compiler_params=pltpu.CompilerParams(
            dimension_semantics=("parallel",),
            vmem_limit_bytes=vmem_limit),
        cost_estimate=cost,
    )(
        x,
        fused["w1"], fused["b1"],
        fused["w2"], fused["b2"],
        fused["w3"], fused["b3"],
    )
    return out[:B, 0]                                              # (B,)


def init_params(key, n_users, n_items, embedding_dim=64, hidden_dims=(128, 64),
                eps=1e-5):
    """Deterministic synthetic parameter init matching the module's shapes.
    Linear weights stored transposed vs. PyTorch: (in_features, out_features)."""
    keys = jax.random.split(key, 16)
    d_in = embedding_dim * 2
    h1, h2 = hidden_dims

    def lin_w(k, fan_in, fan_out):
        bound = 1.0 / jnp.sqrt(fan_in)
        return jax.random.uniform(k, (fan_in, fan_out), jnp.float32, -bound, bound)

    def lin_b(k, fan_in, fan_out):
        bound = 1.0 / jnp.sqrt(fan_in)
        return jax.random.uniform(k, (1, fan_out), jnp.float32, -bound, bound)

    def bn_fold(kg, kb, km, kv, dim):
        gamma = 1.0 + 0.1 * jax.random.normal(kg, (1, dim), jnp.float32)
        beta = 0.1 * jax.random.normal(kb, (1, dim), jnp.float32)
        running_mean = 0.05 * jax.random.normal(km, (1, dim), jnp.float32)
        running_var = jnp.abs(1.0 + 0.1 * jax.random.normal(kv, (1, dim), jnp.float32))
        scale = gamma / jnp.sqrt(running_var + eps)
        shift = beta - running_mean * scale
        return scale, shift

    bn1_scale, bn1_shift = bn_fold(keys[6], keys[7], keys[8], keys[9], h1)
    bn2_scale, bn2_shift = bn_fold(keys[10], keys[11], keys[12], keys[13], h2)

    return {
        "user_embedding": 0.01 * jax.random.normal(keys[0], (n_users, embedding_dim), jnp.float32),
        "item_embedding": 0.01 * jax.random.normal(keys[1], (n_items, embedding_dim), jnp.float32),
        "w1": lin_w(keys[2], d_in, h1), "b1": lin_b(keys[3], d_in, h1),
        "bn1_scale": bn1_scale, "bn1_shift": bn1_shift,
        "w2": lin_w(keys[4], h1, h2), "b2": lin_b(keys[5], h1, h2),
        "bn2_scale": bn2_scale, "bn2_shift": bn2_shift,
        "w3": lin_w(keys[14], h2, 1), "b3": lin_b(keys[15], h2, 1),
    }


def ncf_forward_ref(params, user_ids, item_ids):
    """Pure-JAX reference (unfused BN, f32) for correctness check."""
    x = jnp.concatenate(
        [params["user_embedding"][user_ids], params["item_embedding"][item_ids]],
        axis=1)
    h = x @ params["w1"] + params["b1"]
    h = jnp.maximum(h * params["bn1_scale"] + params["bn1_shift"], 0.0)
    h = h @ params["w2"] + params["b2"]
    h = jnp.maximum(h * params["bn2_scale"] + params["bn2_shift"], 0.0)
    out = jax.nn.sigmoid(h @ params["w3"] + params["b3"])
    return jnp.squeeze(out, axis=-1)


if __name__ == "__main__":
    key = jax.random.PRNGKey(0)
    n_users, n_items, embedding_dim = 32, 48, 64
    B = 20  # not a multiple of the tile -> exercises padding + multi-tile grid

    pkey, ukey, ikey = jax.random.split(key, 3)
    params = init_params(pkey, n_users, n_items, embedding_dim)
    user_ids = jax.random.randint(ukey, (B,), 0, n_users, dtype=jnp.int32)
    item_ids = jax.random.randint(ikey, (B,), 0, n_items, dtype=jnp.int32)

    ref = ncf_forward_ref(params, user_ids, item_ids)

    # f32 path, tiny tile so the small batch spans multiple grid steps.
    fwd_f32 = jax.jit(functools.partial(ncf_forward, tile_b=8,
                                        compute_dtype=jnp.float32))
    out_f32 = jax.block_until_ready(fwd_f32(params, user_ids, item_ids))
    assert out_f32.shape == (B,)
    assert jnp.allclose(out_f32, ref, atol=1e-5, rtol=1e-4), (out_f32, ref)

    # bf16 streamed path (primary perf config on v6e/v7x; f32 accum/epilogue),
    # small tile -> multi-tile grid with 16-row (bf16 sublane) tiles.
    fwd_bf16 = jax.jit(functools.partial(ncf_forward, tile_b=8,
                                         compute_dtype=jnp.bfloat16))
    out_bf16 = jax.block_until_ready(fwd_bf16(params, user_ids, item_ids))
    assert out_bf16.shape == (B,)
    assert jnp.allclose(out_bf16, ref, atol=2e-2, rtol=2e-2), (out_bf16, ref)

    # Default (auto) tile selection path, bf16: single-tile grid at this size.
    fwd_auto = jax.jit(functools.partial(ncf_forward, compute_dtype=jnp.bfloat16))
    out_auto = jax.block_until_ready(fwd_auto(params, user_ids, item_ids))
    assert out_auto.shape == (B,)
    assert jnp.allclose(out_auto, ref, atol=2e-2, rtol=2e-2), (out_auto, ref)

    print("KERNEL_OK")
</pallas_src>

<mosaic_0001>
module attributes {stable_mosaic.version = 11 : i64} {
  func.func @ncf_mlp_kernel(%arg0: i32, %arg1: memref<8x128xf32, #tpu.memory_space<vmem>>, %arg2: memref<128x128xf32, #tpu.memory_space<vmem>>, %arg3: memref<1x128xf32, #tpu.memory_space<vmem>>, %arg4: memref<128x64xf32, #tpu.memory_space<vmem>>, %arg5: memref<1x64xf32, #tpu.memory_space<vmem>>, %arg6: memref<64x1xf32, #tpu.memory_space<vmem>>, %arg7: memref<1x1xf32, #tpu.memory_space<vmem>>, %arg8: memref<8x1xf32, #tpu.memory_space<vmem>>) attributes {dimension_semantics = [#tpu.dimension_semantics<parallel>], iteration_bounds = array<i64: 3>, scalar_prefetch = 0 : i64, scratch_operands = 0 : i64, tpu.core_type = #tpu.core_type<tc>, window_params = [{transform_indices = @transform_0, window_bounds = array<i64: 8, 128>}, {pipeline_mode = #tpu.pipeline_mode<synchronous>, transform_indices = @transform_1, window_bounds = array<i64: 128, 128>}, {pipeline_mode = #tpu.pipeline_mode<synchronous>, transform_indices = @transform_2, window_bounds = array<i64: 1, 128>}, {pipeline_mode = #tpu.pipeline_mode<synchronous>, transform_indices = @transform_3, window_bounds = array<i64: 128, 64>}, {pipeline_mode = #tpu.pipeline_mode<synchronous>, transform_indices = @transform_4, window_bounds = array<i64: 1, 64>}, {pipeline_mode = #tpu.pipeline_mode<synchronous>, transform_indices = @transform_5, window_bounds = array<i64: 64, 1>}, {pipeline_mode = #tpu.pipeline_mode<synchronous>, transform_indices = @transform_6, window_bounds = array<i64: 1, 1>}, {transform_indices = @transform_7, window_bounds = array<i64: 8, 1>}]} {
    %c0 = arith.constant 0 : index
    %c0_0 = arith.constant 0 : index
    %0 = vector.load %arg1[%c0, %c0_0] : memref<8x128xf32, #tpu.memory_space<vmem>>, vector<8x128xf32>
    %c0_1 = arith.constant 0 : index
    %c0_2 = arith.constant 0 : index
    %1 = vector.load %arg2[%c0_1, %c0_2] : memref<128x128xf32, #tpu.memory_space<vmem>>, vector<128x128xf32>
    %cst = arith.constant dense<0.000000e+00> : vector<8x128xf32>
    %2 = tpu.matmul %0, %1, %cst {dimension_numbers = #tpu.dot_dimension_numbers<[1], [0], [0], [1], [0, 0, 1, 1], [], []>} : vector<8x128xf32>, vector<128x128xf32>, vector<8x128xf32> -> vector<8x128xf32>
    %c0_3 = arith.constant 0 : index
    %c0_4 = arith.constant 0 : index
    %3 = vector.load %arg3[%c0_3, %c0_4] : memref<1x128xf32, #tpu.memory_space<vmem>>, vector<1x128xf32>
    %4 = vector.broadcast %3 : vector<1x128xf32> to vector<8x128xf32>
    %5 = arith.addf %2, %4 : vector<8x128xf32>
    %cst_5 = arith.constant 0.000000e+00 : f32
    %6 = vector.broadcast %cst_5 : f32 to vector<8x128xf32>
    %7 = arith.maximumf %5, %6 : vector<8x128xf32>
    %c0_6 = arith.constant 0 : index
    %c0_7 = arith.constant 0 : index
    %8 = vector.load %arg4[%c0_6, %c0_7] : memref<128x64xf32, #tpu.memory_space<vmem>>, vector<128x64xf32>
    %cst_8 = arith.constant dense<0.000000e+00> : vector<8x64xf32>
    %9 = tpu.matmul %7, %8, %cst_8 {dimension_numbers = #tpu.dot_dimension_numbers<[1], [0], [0], [1], [0, 0, 1, 1], [], []>} : vector<8x128xf32>, vector<128x64xf32>, vector<8x64xf32> -> vector<8x64xf32>
    %c0_9 = arith.constant 0 : index
    %c0_10 = arith.constant 0 : index
    %10 = vector.load %arg5[%c0_9, %c0_10] : memref<1x64xf32, #tpu.memory_space<vmem>>, vector<1x64xf32>
    %11 = vector.broadcast %10 : vector<1x64xf32> to vector<8x64xf32>
    %12 = arith.addf %9, %11 : vector<8x64xf32>
    %cst_11 = arith.constant 0.000000e+00 : f32
    %13 = vector.broadcast %cst_11 : f32 to vector<8x64xf32>
    %14 = arith.maximumf %12, %13 : vector<8x64xf32>
    %c0_12 = arith.constant 0 : index
    %c0_13 = arith.constant 0 : index
    %15 = vector.load %arg6[%c0_12, %c0_13] : memref<64x1xf32, #tpu.memory_space<vmem>>, vector<64x1xf32>
    %cst_14 = arith.constant dense<0.000000e+00> : vector<8x1xf32>
    %16 = tpu.matmul %14, %15, %cst_14 {dimension_numbers = #tpu.dot_dimension_numbers<[1], [0], [0], [1], [0, 0, 1, 1], [], []>} : vector<8x64xf32>, vector<64x1xf32>, vector<8x1xf32> -> vector<8x1xf32>
    %c0_15 = arith.constant 0 : index
    %c0_16 = arith.constant 0 : index
    %17 = vector.load %arg7[%c0_15, %c0_16] : memref<1x1xf32, #tpu.memory_space<vmem>>, vector<1x1xf32>
    %18 = vector.broadcast %17 : vector<1x1xf32> to vector<8x1xf32>
    %19 = arith.addf %16, %18 : vector<8x1xf32>
    %20 = arith.negf %19 : vector<8x1xf32>
    %21 = math.exp %20 : vector<8x1xf32>
    %cst_17 = arith.constant 1.000000e+00 : f32
    %22 = vector.broadcast %cst_17 : f32 to vector<8x1xf32>
    %23 = arith.addf %22, %21 : vector<8x1xf32>
    %24 = arith.divf %22, %23 : vector<8x1xf32>
    %c0_18 = arith.constant 0 : index
    %c0_19 = arith.constant 0 : index
    %25 = vector.load %arg8[%c0_18, %c0_19] : memref<8x1xf32, #tpu.memory_space<vmem>>, vector<8x1xf32>
    tpu.vector_store %arg8[%c0_18, %c0_19], %24 {strides = array<i32>} : memref<8x1xf32, #tpu.memory_space<vmem>>, vector<8x1xf32>,
    return
  }
  func.func @transform_0(%arg0: i32) -> (i32, i32) {
    %c0_i32 = arith.constant 0 : i32
    %c0_i32_0 = arith.constant 0 : i32
    return %arg0, %c0_i32 : i32, i32
  }
  func.func @transform_1(%arg0: i32) -> (i32, i32) {
    %c0_i32 = arith.constant 0 : i32
    %c0_i32_0 = arith.constant 0 : i32
    %c0_i32_1 = arith.constant 0 : i32
    return %c0_i32, %c0_i32_0 : i32, i32
  }
  func.func @transform_2(%arg0: i32) -> (i32, i32) {
    %c0_i32 = arith.constant 0 : i32
    %c0_i32_0 = arith.constant 0 : i32
    %c0_i32_1 = arith.constant 0 : i32
    return %c0_i32, %c0_i32_0 : i32, i32
  }
  func.func @transform_3(%arg0: i32) -> (i32, i32) {
    %c0_i32 = arith.constant 0 : i32
    %c0_i32_0 = arith.constant 0 : i32
    %c0_i32_1 = arith.constant 0 : i32
    return %c0_i32, %c0_i32_0 : i32, i32
  }
  func.func @transform_4(%arg0: i32) -> (i32, i32) {
    %c0_i32 = arith.constant 0 : i32
    %c0_i32_0 = arith.constant 0 : i32
    %c0_i32_1 = arith.constant 0 : i32
    return %c0_i32, %c0_i32_0 : i32, i32
  }
  func.func @transform_5(%arg0: i32) -> (i32, i32) {
    %c0_i32 = arith.constant 0 : i32
    %c0_i32_0 = arith.constant 0 : i32
    %c0_i32_1 = arith.constant 0 : i32
    return %c0_i32, %c0_i32_0 : i32, i32
  }
  func.func @transform_6(%arg0: i32) -> (i32, i32) {
    %c0_i32 = arith.constant 0 : i32
    %c0_i32_0 = arith.constant 0 : i32
    %c0_i32_1 = arith.constant 0 : i32
    return %c0_i32, %c0_i32_0 : i32, i32
  }
  func.func @transform_7(%arg0: i32) -> (i32, i32) {
    %c0_i32 = arith.constant 0 : i32
    %c0_i32_0 = arith.constant 0 : i32
    return %arg0, %c0_i32 : i32, i32
  }
}

</mosaic_0001>

<bundles_post_ra>
// kernel: ncf_forward.1
= control target key start
LH: loop header
LB: loop body
LE: loop exit
PB: predicated region body
PF: predicated region fallthrough
CT: control target
= control target key end

     0   :  { %s890_s26 = smov 0   ;;  %s1070_s0 = inlined_call_operand.vmem [shape: f32[24,128], index: 0, kind: input, shape index: {}]   ;;  %s1071_s1 = inlined_call_operand.vmem [shape: f32[128,128], index: 1, kind: input, shape index: {}]   ;;  %s1072_s2 = inlined_call_operand.vmem [shape: f32[1,128], index: 2, kind: input, shape index: {}]   ;;  %s1073_s3 = inlined_call_operand.vmem [shape: f32[128,64], index: 3, kind: input, shape index: {}]   ;;  %s1074_s4 = inlined_call_operand.vmem [shape: f32[1,64], index: 4, kind: input, shape index: {}]   ;;  %s1075_s5 = inlined_call_operand.vmem [shape: f32[64,1], index: 5, kind: input, shape index: {}]   ;;  %s1076_s6 = inlined_call_operand.<no memory space> [shape: f32[1,1], index: 6, kind: input, shape index: {}]   ;;  %s1077_s7 = inlined_call_operand.vmem [shape: f32[24,1], index: 7, kind: output, shape index: {}]  }
   0x1   :  { %v12_v0 = vstv %s1076_s6 }
   0x2   :  { %13 = vst [vmem:[#allocation2] sm:$0x1] %v12_v0 }
   0x3 LB: > { %s615_s27 = sadd.s32 4294967295, %s842_s26   ;;  %p619_p0 = scmp.ge.s32.totalorder %s842_s26, 1  ;;  %s842_s26 = sphi %s890_s26, %s19_s26  }
   0x4   : > { %p238_p1 = scmp.lt.s32.totalorder %s842_s26, 4 }
   0x6   : > { %p239_p2 = pnand %p619_p0, %p238_p1 }
   0x7   : > { %v277_v1 = vld [vmem:[%s1071_s1] sm:$0xff] (!%p239_p2)  ;;  %v278_v2 = vld [vmem:[%s1071_s1 + $0x8] sm:$0xff] (!%p239_p2)  ;;  %v279_v3 = vld [vmem:[%s1071_s1 + $0x10] sm:$0xff] (!%p239_p2)  ;;  %v844_v4 = vmov (!%p239_p2), 0.0|0.0   ;;  %vm845_vm0 = vmmov (!%p239_p2), 0   ;;  %v846_v7 = vmov (!%p239_p2), 0.0  }
   0x8   : > { %242 = sbr.rel (%p239_p2) target bundleno = 714 (0x2ca), region = 48  ;;  %761 = vmatprep.subr.bf16.mxu0 (!%p239_p2), %v844_v4  ;;  %v762_v5 = vpack.c.bf16 (!%p239_p2), %v278_v2, %v277_v1  ;;  %v280_v6 = vld [vmem:[%s1071_s1 + $0x18] sm:$0xff] (!%p239_p2)  ;;  %704 = vmatprep.mubr.msk.f32.mxu0 (!%p239_p2), %vm845_vm0, %v846_v7  ;;  %v281_v9 = vld [vmem:[%s1071_s1 + $0x20] sm:$0xff] (!%p239_p2)  ;;  %v282_v10 = vld [vmem:[%s1071_s1 + $0x28] sm:$0xff] (!%p239_p2)  ;;  %p268_p3 = scmp.lt.s32.totalorder (!%p239_p2), %s615_s27, 2  ;;  %vm480_vm1 = vcmask (!%p239_p2), 523264  }
   0x9   : > { %785 = vmatprep.subr.bf16.mxu1 (!%p239_p2), %v844_v4  ;;  %739 = vmatprep.mubr.msk.f32.mxu1 (!%p239_p2), %vm845_vm0, %v846_v7  ;;  %v765_v8 = vpack.c.bf16 (!%p239_p2), %v280_v6, %v279_v3  ;;  %v371_v11 = vld [vmem:[%s1073_s3] sm:$0xff] (!%p239_p2)  ;;  %v372_v12 = vld [vmem:[%s1073_s3 + $0x8] sm:$0xff] (!%p239_p2)  ;;  %v373_v14 = vld [vmem:[%s1073_s3 + $0x10] sm:$0xff] (!%p239_p2)  ;;  %v768_v16 = vpack.c.bf16 (!%p239_p2), %v282_v10, %v281_v9  ;;  %vm560_vm2 = vcmask (!%p239_p2), 7168  }
   0xa   : > { %763 = vmatpush3.bf16.msra.mxu0 (!%p239_p2), %v762_v5  ;;  %v786_v13 = vpack.c.bf16 (!%p239_p2), %v372_v12, %v371_v11  ;;  %v374_v15 = vld [vmem:[%s1073_s3 + $0x18] sm:$0xff] (!%p239_p2)  ;;  %v283_v17 = vld [vmem:[%s1071_s1 + $0x30] sm:$0xff] (!%p239_p2)  ;;  %v375_v20 = vld [vmem:[%s1073_s3 + $0x20] sm:$0xff] (!%p239_p2) }
   0xb   : > { %764 = vmatprep.subr.bf16.mxu0 (!%p239_p2), %v844_v4  ;;  %v284_v18 = vld [vmem:[%s1071_s1 + $0x38] sm:$0xff] (!%p239_p2)  ;;  %v789_v19 = vpack.c.bf16 (!%p239_p2), %v374_v15, %v373_v14  ;;  %v376_v21 = vld [vmem:[%s1073_s3 + $0x28] sm:$0xff] (!%p239_p2)  ;;  %v285_v23 = vld [vmem:[%s1071_s1 + $0x40] sm:$0xff] (!%p239_p2) }
   0xc   : > { %787 = vmatpush3.bf16.msra.mxu1 (!%p239_p2), %v786_v13  ;;  %v771_v22 = vpack.c.bf16 (!%p239_p2), %v284_v18, %v283_v17  ;;  %v286_v24 = vld [vmem:[%s1071_s1 + $0x48] sm:$0xff] (!%p239_p2)  ;;  %v792_v25 = vpack.c.bf16 (!%p239_p2), %v376_v21, %v375_v20  ;;  %v377_v26 = vld [vmem:[%s1073_s3 + $0x30] sm:$0xff] (!%p239_p2)  ;;  %v378_v27 = vld [vmem:[%s1073_s3 + $0x38] sm:$0xff] (!%p239_p2) }
   0xd   : > { %788 = vmatprep.subr.bf16.mxu1 (!%p239_p2), %v844_v4  ;;  %v774_v28 = vpack.c.bf16 (!%p239_p2), %v286_v24, %v285_v23  ;;  %v287_v29 = vld [vmem:[%s1071_s1 + $0x50] sm:$0xff] (!%p239_p2)  ;;  %v288_v30 = vld [vmem:[%s1071_s1 + $0x58] sm:$0xff] (!%p239_p2)  ;;  %v795_v31 = vpack.c.bf16 (!%p239_p2), %v378_v27, %v377_v26  ;;  %v379_v32 = vld [vmem:[%s1073_s3 + $0x40] sm:$0xff] (!%p239_p2) }
   0xe   : > { %766 = vmatpush3.bf16.msra.mxu0 (!%p239_p2), %v765_v8  ;;  %v380_v33 = vld [vmem:[%s1073_s3 + $0x48] sm:$0xff] (!%p239_p2)  ;;  %v777_v34 = vpack.c.bf16 (!%p239_p2), %v288_v30, %v287_v29  ;;  %v289_v35 = vld [vmem:[%s1071_s1 + $0x60] sm:$0xff] (!%p239_p2)  ;;  %v381_v38 = vld [vmem:[%s1073_s3 + $0x50] sm:$0xff] (!%p239_p2) }
   0xf   : > { %767 = vmatprep.subr.bf16.mxu0 %v844_v4  ;;  %v290_v36 = vld [vmem:[%s1071_s1 + $0x68] sm:$0xff]  ;;  %v798_v37 = vpack.c.bf16 %v380_v33, %v379_v32  ;;  %s1079_s27 = smov (!%p268_p3, %s615_s27), 2  ;;  %v382_v39 = vld [vmem:[%s1073_s3 + $0x58] sm:$0xff]  ;;  %v291_v41 = vld [vmem:[%s1071_s1 + $0x70] sm:$0xff] }
  0x10   : > { %790 = vmatpush3.bf16.msra.mxu1 %v789_v19  ;;  %v780_v40 = vpack.c.bf16 %v290_v36, %v289_v35  ;;  %v292_v42 = vld [vmem:[%s1071_s1 + $0x78] sm:$0xff]  ;;  %v801_v43 = vpack.c.bf16 %v382_v39, %v381_v38  ;;  %s620_s16 = sshll.u32 %s1079_s27, 3  ;;  %v383_v44 = vld [vmem:[%s1073_s3 + $0x60] sm:$0xff]  ;;  %v384_v45 = vld [vmem:[%s1073_s3 + $0x68] sm:$0xff] }
  0x11   : > { %791 = vmatprep.subr.bf16.mxu1 %v844_v4  ;;  %v783_v46 = vpack.c.bf16 %v292_v42, %v291_v41  ;;  %s271_s23 = scalar_lea.vmem %s1070_s0, %s620_s16  ;;  %v804_v47 = vpack.c.bf16 %v384_v45, %v383_v44  ;;  %v385_v49 = vld [vmem:[%s1073_s3 + $0x70] sm:$0xff]  ;;  %v386_v50 = vld [vmem:[%s1073_s3 + $0x78] sm:$0xff]  ;;  %v465_v52 = vld [vmem:[%s1075_s5] sm:$0xff]  ;;  %s275_s30 = scalar_lea.vmem %s1077_s7, %s620_s16 }
  0x12   : > { %769 = vmatpush3.bf16.msra.mxu0 %v768_v16  ;;  %v276_v48 = vld [vmem:[%s271_s23] sm:$0xff]  ;;  %v807_v51 = vpack.c.bf16 %v386_v50, %v385_v49  ;;  %v466_v53 = vld [vmem:[%s1075_s5 + $0x8] sm:$0xff]  ;;  %v467_v54 = vld [vmem:[%s1075_s5 + $0x10] sm:$0xff] }
  0x13   : > { %770 = vmatprep.subr.bf16.mxu0 %v844_v4  ;;  %v810_v55 = vpack.c.bf16 %v466_v53, %v465_v52  ;;  %v468_v56 = vld [vmem:[%s1075_s5 + $0x18] sm:$0xff]  ;;  %v469_v58 = vld [vmem:[%s1075_s5 + $0x20] sm:$0xff]  ;;  %v470_v59 = vld [vmem:[%s1075_s5 + $0x28] sm:$0xff] }
  0x14   : > { %793 = vmatpush3.bf16.msra.mxu1 %v792_v25  ;;  %v813_v57 = vpack.c.bf16 %v468_v56, %v467_v54  ;;  %v816_v60 = vpack.c.bf16 %v470_v59, %v469_v58  ;;  %v622_v61 = vld [vmem:[%s1072_s2] ss:$0 sm:$0xff]  ;;  %v471_v2 = vld [vmem:[%s1075_s5 + $0x30] sm:$0xff]  ;;  %v472_v3 = vld [vmem:[%s1075_s5 + $0x38] sm:$0xff] }
  0x15   : > { %794 = vmatprep.subr.bf16.mxu1 %v844_v4  ;;  %v819_v5 = vpack.c.bf16 %v472_v3, %v471_v2  ;;  %v624_v10 = vld [vmem:[#allocation2] ss:$0 sm:$0xff] }
  0x16   : > { %772 = vmatpush3.bf16.msra.mxu0 %v771_v22 }
  0x17   : > { %773 = vmatprep.subr.bf16.mxu0 %v844_v4 }
  0x18   : > { %796 = vmatpush3.bf16.msra.mxu1 %v795_v31 }
  0x19   : > { %797 = vmatprep.subr.bf16.mxu1 %v844_v4 }
  0x1a   : > { %775 = vmatpush3.bf16.msra.mxu0 %v774_v28 }
  0x1b   : > { %776 = vmatprep.subr.bf16.mxu0 %v844_v4 }
  0x1c   : > { %799 = vmatpush3.bf16.msra.mxu1 %v798_v37 }
  0x1d   : > { %800 = vmatprep.subr.bf16.mxu1 %v844_v4 }
  0x1e   : > { %778 = vmatpush3.bf16.msra.mxu0 %v777_v34 }
  0x1f   : > { %779 = vmatprep.subr.bf16.mxu0 %v844_v4 }
  0x20   : > { %802 = vmatpush3.bf16.msra.mxu1 %v801_v43 }
  0x21   : > { %803 = vmatprep.subr.bf16.mxu1 %v844_v4 }
  0x22   : > { %781 = vmatpush3.bf16.msra.mxu0 %v780_v40 }
  0x23   : > { %782 = vmatprep.subr.bf16.mxu0 %v844_v4 }
  0x24   : > { %805 = vmatpush3.bf16.msra.mxu1 %v804_v47 }
  0x25   : > { %806 = vmatprep.subr.bf16.mxu1 %v844_v4 }
  0x26   : > { %784 = vmatpush3.bf16.msra.mxu0 %v783_v46 }
  0x27   : > { %809 = vmatprep.subr.bf16.mxu0 %v844_v4 }
  0x28   : > { %808 = vmatpush3.bf16.msra.mxu1 %v807_v51 }
  0x29   : > { %705 = vmatmul.mubr.f32.vlgmr.msra.gmra.mrb[0].mxu0 %v276_v48 }
  0x2a   : > { %758 = vmatprep.mubr.msk.f32.mxu0 %vm845_vm0, %v846_v7  ;;  %811 = vmatpush3.bf16.msra.mxu0 %v810_v55 }
  0x2b   : > { %812 = vmatprep.subr.bf16.mxu0 %v844_v4 }
  0x2e   : > { %814 = vmatpush3.bf16.msra.mxu0 %v813_v57 }
  0x2f   : > { %815 = vmatprep.subr.bf16.mxu0 %v844_v4 }
  0x32   : > { %817 = vmatpush3.bf16.msra.mxu0 %v816_v60 }
  0x33   : > { %818 = vmatprep.subr.bf16.mxu0 %v844_v4  ;;  %v623_v4 = vld [vmem:[%s1074_s4] ss:$0 sm:$0xff] }
  0x36   : > { %820 = vmatpush3.bf16.msra.mxu0 %v819_v5 }
  0xfc   : > { %v366_v62 = vpop.f32.mrb[0].mxu0 }
  0xfd   : > { %v367_v63 = vadd.f32 %v622_v61, %v366_v62  ;;  %v706_v0 = vpop.f32.mrb[1].mxu0 }
  0xff   : > { %v370_v1 = vmax.f32 %v367_v63, 0.0 }
 0x101   : > { %740 = vmatmul.mubr.f32.vlgmr.msra.gmra.mrb[0].mxu1 %v370_v1 }
 0x1d4   : > { %v460_v6 = vpop.f32.mrb[0].mxu1 }
 0x1d5   : > { %v461_v7 = vadd.f32 %v623_v4, %v460_v6  ;;  %v741_v8 = vpop.f32.mrb[1].mxu1 }
 0x1d7   : > { %v464_v9 = vmax.f32 %v461_v7, 0.0 }
 0x1d9   : > { %759 = vmatmul.mubr.msk.f32.vlgmr.msra.gmra.mrb[2].mxu0 %vm480_vm1, %v464_v9 }
 0x2ac   : > { %v550_v11 = vpop.f32.mrb[2].mxu0 }
 0x2ad   : > { %v551_v12 = vadd.f32 %v624_v10, %v550_v11  ;;  %v760_v13 = vpop.f32.mrb[3].mxu0 }
 0x2af   : > { %v626_v14 = vmul.f32 -1.442695, %v551_v12 }
 0x2b1   : > { %832 = vpow2.f32 %v626_v14 }
 0x2bb   : > { %v833_v15 = vpop.eup %832 }
 0x2bc   : > { %v557_v16 = vadd.f32 1.0, %v833_v15 }
 0x2be   : > { %834 = vrcp.f32 %v557_v16 }
 0x2c8   : > { %v835_v17 = vpop.eup %834 }
 0x2c9   : > { %561 = vst.msk [vmem:[%s275_s30] sm:$0xff] %vm560_vm2, %v835_v17 }
 0x2ca PF: > { %s19_s26 = sadd.s32 1, %s842_s26  }
 0x2cb   : > { %p16_p4 = scmp.ge.s32.totalorder %s19_s26, 5  }
 0x2cd   :  { %18 = sbr.rel (!%p16_p4) target bundleno = 3 (0x3), region = 78 }

</bundles_post_ra>
